<compile_context>
chip_gen: v7x
topology: tpu7x:2x2x1
jax: 0.10.0
libtpu: 0.0.40
codegen_flags: <defaults>
</compile_context>

<pallas_src>
import jax
import jax.numpy as jnp
from jax import lax
from jax.experimental import pallas as pl
from jax.experimental.pallas import tpu as pltpu


# --------------------------------------------------------------------------
# shared elementwise math (f32)
# --------------------------------------------------------------------------
def _neg_kl_elem(pred, soft):
    """Per-element NEG-KL loss in f32.  pred/soft: (rows, C) f32."""
    # softmax / log-softmax of soft_label along the class axis
    s_max = jnp.max(soft, axis=1, keepdims=True)
    s_shift = soft - s_max
    s_exp = jnp.exp(s_shift)
    s_sum = jnp.sum(s_exp, axis=1, keepdims=True)
    inv_s_sum = 1.0 / s_sum                      # per-row reciprocal
    target = s_exp * inv_s_sum
    log_target = s_shift - jnp.log(s_sum)

    # log-softmax of pred along the class axis
    p_max = jnp.max(pred, axis=1, keepdims=True)
    p_shift = pred - p_max
    log_pred = p_shift - jnp.log(jnp.sum(jnp.exp(p_shift), axis=1, keepdims=True))

    # F.kl_div(log_pred, target, 'none') = target * (log target - log_pred)
    # (xlogy semantics: 0 contribution where target underflows to exactly 0)
    kd_temp = jnp.where(target > 0.0, target * (log_target - log_pred), 0.0)
    # 1 / (1 + exp(x)) == sigmoid(-x): single logistic on the EUP
    return jax.nn.sigmoid(-kd_temp)


# --------------------------------------------------------------------------
# kernel factories
# --------------------------------------------------------------------------
def _make_elem_kernel(weight_mode):
    """Emits the (row_tile, C) elementwise loss block (optionally weighted).

    weight_mode: None | 'row' (N,1 weight) | 'full' (N,C weight).
    """

    def kernel(*refs):
        if weight_mode is None:
            pred_ref, soft_ref, out_ref = refs
        else:
            pred_ref, soft_ref, w_ref, out_ref = refs
        loss = _neg_kl_elem(pred_ref[...].astype(jnp.float32),
                            soft_ref[...].astype(jnp.float32))
        if weight_mode is not None:
            # (rows, 1) or (rows, C) -> broadcasts against (rows, C)
            loss = loss * w_ref[...].astype(jnp.float32)
        out_ref[...] = loss.astype(out_ref.dtype)

    return kernel


def _make_sum_kernel(weight_mode, n_rows, row_tile, ragged):
    """Accumulates the total loss into a resident (1, 1) output block.

    Only the final grid block applies the padded-row mask (built from a
    (row_tile, 1) iota on per-row sums, not a full (row_tile, C) select).
    """

    def kernel(*refs):
        if weight_mode is None:
            pred_ref, soft_ref, sum_ref = refs
        else:
            pred_ref, soft_ref, w_ref, sum_ref = refs
        i = pl.program_id(0)

        @pl.when(i == 0)
        def _():
            sum_ref[...] = jnp.zeros_like(sum_ref)

        loss = _neg_kl_elem(pred_ref[...].astype(jnp.float32),
                            soft_ref[...].astype(jnp.float32))
        if weight_mode is not None:
            loss = loss * w_ref[...].astype(jnp.float32)
        row_sums = jnp.sum(loss, axis=1, keepdims=True)        # (row_tile, 1)

        if ragged:
            last = pl.num_programs(0) - 1

            @pl.when(i < last)
            def _():
                sum_ref[...] += jnp.sum(row_sums)

            @pl.when(i == last)
            def _():
                rows = (lax.broadcasted_iota(jnp.int32, row_sums.shape, 0)
                        + i * row_tile)
                sum_ref[...] += jnp.sum(
                    jnp.where(rows < n_rows, row_sums, 0.0))
        else:
            sum_ref[...] += jnp.sum(row_sums)

    return kernel


# --------------------------------------------------------------------------
# wrapper helpers
# --------------------------------------------------------------------------
def _round_up(x, m):
    return (x + m - 1) // m * m


def _vmem_config():
    """(tile_budget_bytes, vmem_limit_bytes, row_cap) per TPU generation."""
    vmem_cap = None
    try:
        vmem_cap = int(pltpu.get_tpu_info().vmem_capacity_bytes)
    except Exception:
        pass
    if vmem_cap is None:
        try:
            kind = jax.devices()[0].device_kind.lower()
            vmem_cap = (64 * 2**20 if ("v7" in kind or "7x" in kind)
                        else 128 * 2**20)
        except Exception:
            vmem_cap = 64 * 2**20                 # conservative default
    if vmem_cap >= 100 * 2**20:                   # v5e / v6e: 128 MiB physical
        return 16 * 2**20, 64 * 2**20, 2048
    return 8 * 2**20, 32 * 2**20, 1024            # v7x (64 MiB) or unknown


def _choose_row_tile(n_rows, n_cols, n_streams, packing, budget_bytes, row_cap):
    """Largest row tile (multiple of `packing`) fitting the VMEM budget.

    Budget covers double-buffered DMA streams *and* ~6 live f32
    (row_tile, round_up(C,128)) intermediates created by _neg_kl_elem.
    """
    c_lanes = _round_up(max(n_cols, 1), 128)      # VMEM lane padding
    n_temps = 6
    bytes_per_row = (2 * n_streams + n_temps) * c_lanes * 4
    rt = budget_bytes // bytes_per_row
    rt = max(packing, rt // packing * packing)
    rt = min(rt, row_cap)
    rt = min(rt, _round_up(n_rows, packing))      # never bigger than input
    return int(rt)


# --------------------------------------------------------------------------
# wrapper
# --------------------------------------------------------------------------
def _neg_kl_div_pallas(pred, soft_label, weight=None, *, want_elem):
    """Returns (N, C) elementwise loss if want_elem else a scalar f32 sum."""
    assert pred.shape == soft_label.shape
    N, C = pred.shape

    # weight handling: keep it skinny / in original dtype, expand in-kernel.
    weight_mode = None
    w_arr = None
    if weight is not None:
        if weight.ndim == 1 or (weight.ndim == 2 and weight.shape[1] == 1):
            weight_mode = "row"
            w_arr = weight.reshape(N, 1)
        else:
            assert weight.shape == (N, C)
            weight_mode = "full"
            w_arr = weight

    budget, vmem_limit, row_cap = _vmem_config()
    min_itemsize = min(jnp.dtype(pred.dtype).itemsize,
                       jnp.dtype(soft_label.dtype).itemsize)
    packing = max(8, 32 // max(min_itemsize, 1))  # 8 f32 / 16 bf16 / 32 int8
    n_streams = (2 + (1 if want_elem else 0)
                 + (1 if weight_mode == "full" else 0))
    row_tile = _choose_row_tile(N, C, n_streams, packing, budget, row_cap)
    nblocks = pl.cdiv(N, row_tile)
    ragged = (N % row_tile) != 0

    inputs = [pred, soft_label]
    in_specs = [pl.BlockSpec((row_tile, C), lambda i: (i, 0)),
                pl.BlockSpec((row_tile, C), lambda i: (i, 0))]
    if weight_mode == "row":
        inputs.append(w_arr)
        in_specs.append(pl.BlockSpec((row_tile, 1), lambda i: (i, 0)))
    elif weight_mode == "full":
        inputs.append(w_arr)
        in_specs.append(pl.BlockSpec((row_tile, C), lambda i: (i, 0)))

    in_bytes = sum(int(x.size) * jnp.dtype(x.dtype).itemsize for x in inputs)

    if want_elem:
        out_shape = jax.ShapeDtypeStruct((N, C), pred.dtype)
        out_specs = pl.BlockSpec((row_tile, C), lambda i: (i, 0))
        out_bytes = N * C * jnp.dtype(pred.dtype).itemsize
        kernel = _make_elem_kernel(weight_mode)
        dim_sem = ("parallel",)                   # independent output blocks
    else:
        # single resident accumulator block (block shape == full array dims)
        out_shape = jax.ShapeDtypeStruct((1, 1), jnp.float32)
        out_specs = pl.BlockSpec((1, 1), lambda i: (0, 0))
        out_bytes = 4
        kernel = _make_sum_kernel(weight_mode, N, row_tile, ragged)
        dim_sem = ("arbitrary",)                  # reduction over the grid

    cost = pl.CostEstimate(
        flops=int(15 * N * C),
        transcendentals=int(3 * N * C),
        bytes_accessed=int(in_bytes + out_bytes),
    )

    out = pl.pallas_call(
        kernel,
        out_shape=out_shape,
        grid_spec=pltpu.PrefetchScalarGridSpec(
            num_scalar_prefetch=0,
            grid=(int(nblocks),),
            in_specs=in_specs,
            out_specs=out_specs,
        ),
        compiler_params=pltpu.CompilerParams(
            dimension_semantics=dim_sem,
            vmem_limit_bytes=vmem_limit,
        ),
        cost_estimate=cost,
    )(*inputs)

    if want_elem:
        return out
    return out[0, 0]


# --------------------------------------------------------------------------
# module
# --------------------------------------------------------------------------
class NEGKLDivLoss:
    """JAX/Pallas port of mmdet NEGKLDivLoss (no trainable parameters).

    Note: with a weight and reduction='mean' (no avg_factor), the mean
    divides by N*C (mmdet weight_reduce_loss convention), not by sum(weight).
    """

    def __init__(self, reduction="mean", loss_weight=1.0):
        self.reduction = reduction
        self.loss_weight = loss_weight

    def __call__(self, pred, soft_label, weight=None, avg_factor=None,
                 reduction_override=None):
        assert reduction_override in (None, "none", "mean", "sum")
        reduction = reduction_override if reduction_override else self.reduction
        N, C = pred.shape

        if reduction == "none":
            # elementwise loss (weight fused in-kernel if present);
            # avg_factor is ignored for 'none' as in mmdet weight_reduce_loss.
            loss = _neg_kl_div_pallas(pred, soft_label, weight, want_elem=True)
        else:
            total = _neg_kl_div_pallas(pred, soft_label, weight,
                                       want_elem=False)
            if avg_factor is None:
                loss = total / (N * C) if reduction == "mean" else total
            else:
                if reduction == "mean":
                    loss = total / avg_factor
                else:
                    raise ValueError(
                        'avg_factor can not be used with reduction="sum"')

        return self.loss_weight * loss


# --------------------------------------------------------------------------
# plain-JAX reference for verification
# --------------------------------------------------------------------------
def _reference(pred, soft_label, loss_weight=1.0, reduction="mean"):
    target = jax.nn.softmax(soft_label, axis=1)
    log_pred = jax.nn.log_softmax(pred, axis=1)
    kd_temp = target * (jnp.log(target) - log_pred)
    loss = 1.0 / (1.0 + jnp.exp(kd_temp))
    if reduction == "mean":
        loss = jnp.mean(loss)
    elif reduction == "sum":
        loss = jnp.sum(loss)
    return loss_weight * loss


if __name__ == "__main__":
    key = jax.random.PRNGKey(0)
    k1, k2, k3, k4, k5, k6 = jax.random.split(key, 6)

    loss_mod = NEGKLDivLoss(reduction="mean", loss_weight=1.0)

    # --- shape 1: small detection-style (N, n+1) ------------------------------
    N1, C1 = 16, 21
    pred1 = jax.random.normal(k1, (N1, C1), dtype=jnp.float32)
    soft1 = jax.random.normal(k2, (N1, C1), dtype=jnp.float32)

    out_mean = jax.block_until_ready(loss_mod(pred1, soft1))
    ref_mean = _reference(pred1, soft1, reduction="mean")
    assert jnp.allclose(out_mean, ref_mean, atol=1e-5, rtol=1e-4), (out_mean, ref_mean)

    out_sum = jax.block_until_ready(loss_mod(pred1, soft1, reduction_override="sum"))
    ref_sum = _reference(pred1, soft1, reduction="sum")
    assert jnp.allclose(out_sum, ref_sum, atol=1e-4, rtol=1e-4), (out_sum, ref_sum)

    out_none = jax.block_until_ready(loss_mod(pred1, soft1, reduction_override="none"))
    ref_none = _reference(pred1, soft1, reduction="none")
    assert out_none.shape == (N1, C1)
    assert jnp.allclose(out_none, ref_none, atol=1e-5, rtol=1e-4)

    # --- shape 2: rows not a multiple of the tile -> exercises ragged last
    #     block (no wrapper pad), fused full-weight and per-row-weight paths ---
    N2, C2 = 300, 81
    pred2 = jax.random.normal(k3, (N2, C2), dtype=jnp.float32)
    soft2 = jax.random.normal(k4, (N2, C2), dtype=jnp.float32)
    w_full = jax.random.uniform(k5, (N2, C2), dtype=jnp.float32)
    w_row = jax.random.uniform(k6, (N2,), dtype=jnp.float32)

    out2 = jax.block_until_ready(loss_mod(pred2, soft2))
    ref2 = _reference(pred2, soft2, reduction="mean")
    assert jnp.allclose(out2, ref2, atol=1e-5, rtol=1e-4), (out2, ref2)

    ref_none2 = _reference(pred2, soft2, reduction="none")

    out2w = jax.block_until_ready(
        loss_mod(pred2, soft2, weight=w_full, avg_factor=123.0))
    ref2w = jnp.sum(ref_none2 * w_full) / 123.0
    assert jnp.allclose(out2w, ref2w, atol=1e-4, rtol=1e-4), (out2w, ref2w)

    out2r = jax.block_until_ready(
        loss_mod(pred2, soft2, weight=w_row, avg_factor=50.0))
    ref2r = jnp.sum(ref_none2 * w_row[:, None]) / 50.0
    assert jnp.allclose(out2r, ref2r, atol=1e-4, rtol=1e-4), (out2r, ref2r)

    out2wn = jax.block_until_ready(
        loss_mod(pred2, soft2, weight=w_full, reduction_override="none"))
    ref2wn = ref_none2 * w_full
    assert out2wn.shape == (N2, C2)
    assert jnp.allclose(out2wn, ref2wn, atol=1e-5, rtol=1e-4)

    print("KERNEL_OK")
</pallas_src>

<mosaic_0001>
module attributes {stable_mosaic.version = 11 : i64} {
  func.func @kernel(%arg0: i32, %arg1: memref<16x21xf32, #tpu.memory_space<vmem>>, %arg2: memref<16x21xf32, #tpu.memory_space<vmem>>, %arg3: memref<1x1xf32, #tpu.memory_space<vmem>>) attributes {dimension_semantics = [#tpu.dimension_semantics<arbitrary>], iteration_bounds = array<i64: 1>, scalar_prefetch = 0 : i64, scratch_operands = 0 : i64, tpu.core_type = #tpu.core_type<tc>, window_params = [{transform_indices = @transform_0, window_bounds = array<i64: 16, 21>}, {transform_indices = @transform_1, window_bounds = array<i64: 16, 21>}, {pipeline_mode = #tpu.pipeline_mode<synchronous>, transform_indices = @transform_2, window_bounds = array<i64: 1, 1>}]} {
    %c0_i32 = arith.constant 0 : i32
    %0 = arith.cmpi eq, %arg0, %c0_i32 : i32
    %1 = arith.extui %0 : i1 to i32
    %c0_i32_0 = arith.constant 0 : i32
    %2 = arith.cmpi ne, %1, %c0_i32_0 : i32
    scf.if %2 {
      %cst_18 = arith.constant 0.000000e+00 : f32
      %52 = vector.broadcast %cst_18 : f32 to vector<1x1xf32>
      %c0_19 = arith.constant 0 : index
      %c0_20 = arith.constant 0 : index
      %53 = vector.load %arg3[%c0_19, %c0_20] : memref<1x1xf32, #tpu.memory_space<vmem>>, vector<1x1xf32>
      tpu.vector_store %arg3[%c0_19, %c0_20], %52 {strides = array<i32>} : memref<1x1xf32, #tpu.memory_space<vmem>>, vector<1x1xf32>,
    } else {
    }
    %c0 = arith.constant 0 : index
    %c0_1 = arith.constant 0 : index
    %3 = vector.load %arg1[%c0, %c0_1] : memref<16x21xf32, #tpu.memory_space<vmem>>, vector<16x21xf32>
    %c0_2 = arith.constant 0 : index
    %c0_3 = arith.constant 0 : index
    %4 = vector.load %arg2[%c0_2, %c0_3] : memref<16x21xf32, #tpu.memory_space<vmem>>, vector<16x21xf32>
    %cst = arith.constant dense<0xFF800000> : vector<16xf32>
    %5 = vector.multi_reduction <maximumf>, %4, %cst [1] : vector<16x21xf32> to vector<16xf32>
    %6 = vector.shape_cast %5 : vector<16xf32> to vector<16x1xf32>
    %7 = vector.broadcast %6 : vector<16x1xf32> to vector<16x21xf32>
    %8 = arith.subf %4, %7 : vector<16x21xf32>
    %9 = math.exp %8 : vector<16x21xf32>
    %cst_4 = arith.constant dense<0.000000e+00> : vector<16xf32>
    %10 = vector.multi_reduction <add>, %9, %cst_4 [1] : vector<16x21xf32> to vector<16xf32>
    %11 = vector.shape_cast %10 : vector<16xf32> to vector<16x1xf32>
    %cst_5 = arith.constant 1.000000e+00 : f32
    %12 = vector.broadcast %cst_5 : f32 to vector<16x1xf32>
    %13 = arith.divf %12, %11 : vector<16x1xf32>
    %14 = vector.broadcast %13 : vector<16x1xf32> to vector<16x21xf32>
    %15 = arith.mulf %9, %14 : vector<16x21xf32>
    %16 = math.log %11 : vector<16x1xf32>
    %17 = vector.broadcast %16 : vector<16x1xf32> to vector<16x21xf32>
    %18 = arith.subf %8, %17 : vector<16x21xf32>
    %cst_6 = arith.constant dense<0xFF800000> : vector<16xf32>
    %19 = vector.multi_reduction <maximumf>, %3, %cst_6 [1] : vector<16x21xf32> to vector<16xf32>
    %20 = vector.shape_cast %19 : vector<16xf32> to vector<16x1xf32>
    %21 = vector.broadcast %20 : vector<16x1xf32> to vector<16x21xf32>
    %22 = arith.subf %3, %21 : vector<16x21xf32>
    %23 = math.exp %22 : vector<16x21xf32>
    %cst_7 = arith.constant dense<0.000000e+00> : vector<16xf32>
    %24 = vector.multi_reduction <add>, %23, %cst_7 [1] : vector<16x21xf32> to vector<16xf32>
    %25 = vector.shape_cast %24 : vector<16xf32> to vector<16x1xf32>
    %26 = math.log %25 : vector<16x1xf32>
    %27 = vector.broadcast %26 : vector<16x1xf32> to vector<16x21xf32>
    %28 = arith.subf %22, %27 : vector<16x21xf32>
    %cst_8 = arith.constant 0.000000e+00 : f32
    %29 = vector.broadcast %cst_8 : f32 to vector<16x21xf32>
    %30 = arith.cmpf ogt, %15, %29 : vector<16x21xf32>
    %31 = arith.subf %18, %28 : vector<16x21xf32>
    %32 = arith.mulf %15, %31 : vector<16x21xf32>
    %cst_9 = arith.constant 0.000000e+00 : f32
    %33 = vector.broadcast %cst_9 : f32 to vector<16x21xf32>
    %34 = arith.select %30, %32, %33 : vector<16x21xi1>, vector<16x21xf32>
    %cst_10 = arith.constant 0.000000e+00 : f32
    %35 = vector.broadcast %cst_10 : f32 to vector<16x21xf32>
    %36 = arith.subf %35, %34 : vector<16x21xf32>
    %37 = arith.negf %36 : vector<16x21xf32>
    %38 = math.exp %37 : vector<16x21xf32>
    %cst_11 = arith.constant 1.000000e+00 : f32
    %39 = vector.broadcast %cst_11 : f32 to vector<16x21xf32>
    %40 = arith.addf %39, %38 : vector<16x21xf32>
    %41 = arith.divf %39, %40 : vector<16x21xf32>
    %cst_12 = arith.constant dense<0.000000e+00> : vector<16xf32>
    %42 = vector.multi_reduction <add>, %41, %cst_12 [1] : vector<16x21xf32> to vector<16xf32>
    %43 = vector.shape_cast %42 : vector<16xf32> to vector<16x1xf32>
    %c0_13 = arith.constant 0 : index
    %c0_14 = arith.constant 0 : index
    %44 = vector.load %arg3[%c0_13, %c0_14] : memref<1x1xf32, #tpu.memory_space<vmem>>, vector<1x1xf32>
    %45 = vector.shape_cast %43 : vector<16x1xf32> to vector<1x16x1xf32>
    %cst_15 = arith.constant dense<0.000000e+00> : vector<1xf32>
    %46 = vector.multi_reduction <add>, %45, %cst_15 [1, 2] : vector<1x16x1xf32> to vector<1xf32>
    %47 = vector.shape_cast %46 : vector<1xf32> to vector<1x1x1xf32>
    %48 = vector.extract %47[0, 0, 0] : f32 from vector<1x1x1xf32>
    %49 = vector.broadcast %48 : f32 to vector<1x1xf32>
    %50 = arith.addf %44, %49 : vector<1x1xf32>
    %c0_16 = arith.constant 0 : index
    %c0_17 = arith.constant 0 : index
    %51 = vector.load %arg3[%c0_16, %c0_17] : memref<1x1xf32, #tpu.memory_space<vmem>>, vector<1x1xf32>
    tpu.vector_store %arg3[%c0_16, %c0_17], %50 {strides = array<i32>} : memref<1x1xf32, #tpu.memory_space<vmem>>, vector<1x1xf32>,
    return
  }
  func.func @transform_0(%arg0: i32) -> (i32, i32) {
    %c0_i32 = arith.constant 0 : i32
    %c0_i32_0 = arith.constant 0 : i32
    return %arg0, %c0_i32 : i32, i32
  }
  func.func @transform_1(%arg0: i32) -> (i32, i32) {
    %c0_i32 = arith.constant 0 : i32
    %c0_i32_0 = arith.constant 0 : i32
    return %arg0, %c0_i32 : i32, i32
  }
  func.func @transform_2(%arg0: i32) -> (i32, i32) {
    %c0_i32 = arith.constant 0 : i32
    %c0_i32_0 = arith.constant 0 : i32
    %c0_i32_1 = arith.constant 0 : i32
    return %c0_i32, %c0_i32_0 : i32, i32
  }
}

</mosaic_0001>

<bundles_post_ra>
// kernel: tpu_custom_call.1
= control target key start
LH: loop header
LB: loop body
LE: loop exit
PB: predicated region body
PF: predicated region fallthrough
CT: control target
= control target key end

     0   :  { %7 = vsyncpa [#allocation3], 0  ;;  %s346_s0 = inlined_call_operand.hbm [shape: f32[16,21], index: 0, kind: input, shape index: {}]   ;;  %s347_s1 = inlined_call_operand.hbm [shape: f32[16,21], index: 1, kind: input, shape index: {}]   ;;  %s348_s2 = inlined_call_operand.hbm [shape: f32[1,1], index: 2, kind: output, shape index: {}]  }
   0x1   :  { %8 = vsyncpa [#allocation6], 0 }
   0x2   :  { %9 = vsyncpa [#allocation4], 0  ;;  %s277_s9 = smov [#allocation2]   ;;  %s205_s13 = scalar_lea.hbm %s346_s0, 256 }
   0x3   :  { %s15_s10 = sshll.u32 %s277_s9, 4  ;;  %p206_p0 = scmp.ne.s32.totalorder %s346_s0, %s205_s13  ;;  %s16_s10 = int_to_ptr.vmem [resolvable:$true] %s15_s10 }
   0x4   :  { %p209_p1 = scmp.lt.u32.totalorder %s205_s13, %s346_s0 }
   0x6   :  { %p211_p2 = pnand %p209_p1, %p206_p0 }
   0x8   :  { %214 = shalt.err (!%p211_p2)
}
   0x9   :  { %s215_s18 = scalar_lea.vmem %s16_s10, 256  ;;  %p220_p4 = scmp.lt.s32.totalorder %s16_s10, %s16_s10 }
   0xa   :  { %p216_p3 = scmp.ne.s32.totalorder %s16_s10, %s215_s18  ;;  %p221_p5 = scmp.lt.s32.totalorder %s215_s18, %s215_s18 }
   0xc   :  { %p222_p6 = por %p221_p5, %p220_p4 }
   0xe   :  { %p223_p7 = pnand %p222_p6, %p216_p3 }
  0x10   :  { %226 = shalt.err (!%p223_p7)
}
  0x11   :  { %s278_s19 = smov 128   ;;  %s279_s20 = smov 8  }
  0x12   :  { %21 = dma.hbm_to_vmem [thread:$0]  %s346_s0, 256, %s16_s10, [#allocation3], %s278_s19, %s278_s19, %s279_s20  }
  0x13   :  { %s280_s23 = smov [#allocation5]   ;;  %s227_s27 = scalar_lea.hbm %s347_s1, 256 }
  0x14   :  { %s27_s24 = sshll.u32 %s280_s23, 4  ;;  %p228_p8 = scmp.ne.s32.totalorder %s347_s1, %s227_s27  ;;  %s28_s24 = int_to_ptr.vmem [resolvable:$true] %s27_s24 }
  0x15   :  { %p231_p9 = scmp.lt.u32.totalorder %s227_s27, %s347_s1 }
  0x17   :  { %p233_p10 = pnand %p231_p9, %p228_p8 }
  0x19   :  { %236 = shalt.err (!%p233_p10)
}
  0x1a   :  { %s237_s4 = scalar_lea.vmem %s28_s24, 256  ;;  %p242_p12 = scmp.lt.s32.totalorder %s28_s24, %s28_s24 }
  0x1b   :  { %p238_p11 = scmp.ne.s32.totalorder %s28_s24, %s237_s4  ;;  %p243_p13 = scmp.lt.s32.totalorder %s237_s4, %s237_s4 }
  0x1d   :  { %p244_p0 = por %p243_p13, %p242_p12 }
  0x1f   :  { %p245_p1 = pnand %p244_p0, %p238_p11 }
  0x21   :  { %248 = shalt.err (!%p245_p1)
}
  0x22   :  { %33 = dma.hbm_to_vmem [thread:$0]  %s347_s1, 256, %s28_s24, [#allocation6], %s278_s19, %s278_s19, %s279_s20  }
  0x23   :  { %271 = dma.done.wait [#allocation3], 256  }
  0x24   :  { %272 = vsyncadd [#allocation3], 4294967040 }
  0x25   :  { %273 = dma.done.wait [#allocation6], 256  }
  0x26   :  { %274 = vsyncadd [#allocation6], 4294967040  ;;  %vm44_vm0 = vcmask 0   ;;  %v281_v0 = vmov 0.0   ;;  %vm50_vm1 = vcmask 171008   ;;  %v48_v1 = vld [vmem:[#allocation5] sm:$0xff] }
  0x27   :  { %45 = vst.msk [vmem:[#allocation7] sm:$0x1] %vm44_vm0, %v281_v0  ;;  %v49_v2 = vld [vmem:[#allocation5 + $0x8] sm:$0xff]  ;;  %v46_v3 = vld [vmem:[#allocation2] sm:$0xff]  ;;  %v51_v4 = vsel %vm50_vm1, %v48_v1, -inf  ;;  %v47_v6 = vld [vmem:[#allocation2 + $0x8] sm:$0xff] }
  0x28   :  { %v81_v5 = vsel %vm50_vm1, %v46_v3, -inf  ;;  %52 = vmax.xlane.f32.xlu0 %v51_v4  ;;  %v54_v7 = vsel %vm50_vm1, %v49_v2, -inf  ;;  %v84_v8 = vsel %vm50_vm1, %v47_v6, -inf  ;;  %vm134_vm4 = vcmask 7168   ;;  %s282_s1 = smov [#allocation7]  }
  0x29   :  { %82 = vmax.xlane.f32.xlu1 %v81_v5  ;;  %s157_s6 = sshll.u32 %s282_s1, 4  ;;  %s158_s6 = int_to_ptr.vmem [resolvable:$true] %s157_s6 }
  0x2a   :  { %s249_s8 = scalar_lea.vmem %s158_s6, 16  ;;  %s253_s9 = scalar_lea.vmem %s158_s6, 32 }
  0x2b   :  { %p250_p2 = scmp.ne.s32.totalorder %s158_s6, %s249_s8  ;;  %p254_p3 = scmp.lt.s32.totalorder %s158_s6, %s158_s6 }
  0x2c   :  { %55 = vmax.xlane.f32.xlu0 %v54_v7  ;;  %p255_p4 = scmp.lt.s32.totalorder %s253_s9, %s249_s8 }
  0x2d   :  { %85 = vmax.xlane.f32.xlu1 %v84_v8 }
  0x2e   :  { %p256_p5 = por %p255_p4, %p254_p3 }
  0x30   :  { %p257_p6 = pnand %p256_p5, %p250_p2 }
  0xb5   :  { %v53_v9 = vpop.xlane.xlu0 %52 }
  0xb6   :  { %v83_v10 = vpop.xlane.xlu1 %82  ;;  %v57_v11 = vsub.f32 %v48_v1, %v53_v9 }
  0xb7   :  { %v87_v12 = vsub.f32 %v46_v3, %v83_v10 }
  0xb8   :  { %v59_v13 = vmul.f32 1.442695, %v57_v11 }
  0xb9   :  { %v89_v14 = vmul.f32 1.442695, %v87_v12  ;;  %v56_v15 = vpop.xlane.xlu0 %55 }
  0xba   :  { %v86_v16 = vpop.xlane.xlu1 %85  ;;  %177 = vpow2.f32 %v59_v13  ;;  %v58_v17 = vsub.f32 %v49_v2, %v56_v15  ;;  %v133_v15 = vld [vmem:[#allocation7] sm:$0x1] }
  0xbb   :  { %v88_v18 = vsub.f32 %v47_v6, %v86_v16  ;;  %179 = vpow2.f32 %v89_v14 }
  0xbc   :  { %v61_v19 = vmul.f32 1.442695, %v58_v17 }
  0xbd   :  { %v91_v20 = vmul.f32 1.442695, %v88_v18 }
  0xbe   :  { %181 = vpow2.f32 %v61_v19 }
  0xbf   :  { %183 = vpow2.f32 %v91_v20 }
  0xc4   :  { %v178_v21 = vpop.eup %177 }
  0xc5   :  { %v180_v22 = vpop.eup %179  ;;  %v63_v23 = vsel %vm50_vm1, %v178_v21, 0.0 }
  0xc6   :  { %64 = vadd.xlane.f32.xlu0 %v63_v23  ;;  %v93_v24 = vsel %vm50_vm1, %v180_v22, 0.0 }
  0xc8   :  { %v182_v25 = vpop.eup %181 }
  0xc9   :  { %v184_v26 = vpop.eup %183  ;;  %v66_v27 = vsel %vm50_vm1, %v182_v25, 0.0 }
  0xca   :  { %67 = vadd.xlane.f32.xlu1 %v66_v27  ;;  %94 = vadd.xlane.f32.xlu0 %v93_v24  ;;  %v96_v28 = vsel %vm50_vm1, %v184_v26, 0.0 }
  0xce   :  { %97 = vadd.xlane.f32.xlu1 %v96_v28 }
 0x153   :  { %v65_v29 = vpop.xlane.xlu0 %64 }
 0x154   :  { %185 = vlog2.f32 %v65_v29 }
 0x157   :  { %v95_v30 = vpop.xlane.xlu0 %94  ;;  %v68_v31 = vpop.xlane.xlu1 %67 }
 0x158   :  { %187 = vlog2.f32 %v95_v30 }
 0x159   :  { %189 = vrcp.f32 %v65_v29 }
 0x15a   :  { %191 = vlog2.f32 %v68_v31 }
 0x15b   :  { %v98_v32 = vpop.xlane.xlu1 %97 }
 0x15c   :  { %193 = vlog2.f32 %v98_v32 }
 0x15d   :  { %195 = vrcp.f32 %v68_v31 }
 0x15e   :  { %v186_v33 = vpop.eup %185 }
 0x15f   :  { %v76_v34 = vmul.f32 0.6931472, %v186_v33 }
 0x161   :  { %v79_v39 = vsub.f32 %v57_v11, %v76_v34 }
 0x162   :  { %v188_v35 = vpop.eup %187 }
 0x163   :  { %v190_v36 = vpop.eup %189  ;;  %v100_v37 = vmul.f32 0.6931472, %v188_v35 }
 0x164   :  { %v192_v38 = vpop.eup %191  ;;  %v73_v43 = vmul.f32 %v190_v36, %v178_v21 }
 0x165   :  { %v103_v40 = vsub.f32 %v87_v12, %v100_v37  ;;  %v78_v41 = vmul.f32 0.6931472, %v192_v38 }
 0x166   :  { %v194_v42 = vpop.eup %193  ;;  %vm105_vm2 = vcmp.gt.f32.partialorder %v73_v43, 0.0 }
 0x167   :  { %v196_v44 = vpop.eup %195  ;;  %v107_v45 = vsub.f32 %v79_v39, %v103_v40  ;;  %v102_v46 = vmul.f32 0.6931472, %v194_v42  ;;  %v80_v48 = vsub.f32 %v58_v17, %v78_v41 }
 0x168   :  { %v74_v50 = vmul.f32 %v196_v44, %v182_v25 }
 0x169   :  { %v109_v47 = vmul.f32 %v107_v45, %v73_v43  ;;  %v104_v49 = vsub.f32 %v88_v18, %v102_v46 }
 0x16a   :  { %vm106_vm3 = vcmp.gt.f32.partialorder %v74_v50, 0.0 }
 0x16b   :  { %v111_v51 = vsel %vm105_vm2, %v109_v47, 0.0  ;;  %v108_v52 = vsub.f32 %v80_v48, %v104_v49 }
 0x16c   :  { %v113_v53 = vsub.f32 0.0, %v111_v51 }
 0x16d   :  { %v110_v54 = vmul.f32 %v108_v52, %v74_v50 }
 0x16e   :  { %v167_v55 = vmul.f32 -1.442695, %v113_v53 }
 0x16f   :  { %v112_v56 = vsel %vm106_vm3, %v110_v54, 0.0 }
 0x170   :  { %197 = vpow2.f32 %v167_v55  ;;  %v114_v57 = vsub.f32 0.0, %v112_v56 }
 0x172   :  { %v168_v58 = vmul.f32 -1.442695, %v114_v57 }
 0x174   :  { %199 = vpow2.f32 %v168_v58 }
 0x17a   :  { %v198_v59 = vpop.eup %197 }
 0x17b   :  { %v121_v60 = vadd.f32 1.0, %v198_v59 }
 0x17d   :  { %201 = vrcp.f32 %v121_v60 }
 0x17e   :  { %v200_v61 = vpop.eup %199 }
 0x17f   :  { %v122_v62 = vadd.f32 1.0, %v200_v61 }
 0x181   :  { %203 = vrcp.f32 %v122_v62 }
 0x187   :  { %v202_v63 = vpop.eup %201 }
 0x188   :  { %v127_v0 = vsel %vm50_vm1, %v202_v63, 0.0 }
 0x189   :  { %128 = vadd.xlane.f32.xlu0 %v127_v0 }
 0x18b   :  { %v204_v1 = vpop.eup %203 }
 0x18c   :  { %v130_v2 = vsel %vm50_vm1, %v204_v1, 0.0 }
 0x18d   :  { %131 = vadd.xlane.f32.xlu1 %v130_v2 }
 0x216   :  { %v129_v3 = vpop.xlane.xlu0 %128 }
 0x217   :  { %v135_v5 = vsel %vm134_vm4, %v129_v3, 0.0 }
 0x21a   :  { %v132_v4 = vpop.xlane.xlu1 %131 }
 0x21b   :  { %v136_v6 = vsel %vm134_vm4, %v132_v4, 0.0 }
 0x21c   :  { %v137_v7 = vadd.f32 %v136_v6, %v135_v5 }
 0x21e   :  { %138 = vadd.xlane.f32.xlu0 %v137_v7 }
 0x2ab   :  { %v139_v8 = vpop.xlane.xlu0 %138 }
 0x2ac   :  { %v140_v9 = vrot.slane %v139_v8, 4 }
 0x2ae   :  { %v141_v10 = vadd.f32 %v140_v9, %v139_v8 }
 0x2b0   :  { %v142_v11 = vrot.slane %v141_v10, 2 }
 0x2b2   :  { %v143_v12 = vadd.f32 %v142_v11, %v141_v10 }
 0x2b4   :  { %v144_v13 = vrot.slane %v143_v12, 1 }
 0x2b6   :  { %v145_v14 = vadd.f32 %v144_v13, %v143_v12 }
 0x2b8   :  { %169 = vpush %v145_v14 }
 0x2e9   :  { %s170_s7 = spop %169 }
 0x2ea   :  { %v147_v16 = vstv %s170_s7 }
 0x2eb   :  { %v148_v17 = vadd.f32 %v147_v16, %v133_v15 }
 0x2ed   :  { %150 = vst.msk [vmem:[#allocation7] sm:$0x1] %vm44_vm0, %v148_v17 }
 0x2ee   :  { %260 = shalt.err (!%p257_p6)
}
 0x2ef   :  { %s261_s12 = scalar_lea.hbm %s348_s2, 16 }
 0x2f0   :  { %p262_p7 = scmp.ne.s32.totalorder %s348_s2, %s261_s12  ;;  %p265_p8 = scmp.lt.u32.totalorder %s261_s12, %s348_s2 }
 0x2f2   :  { %p267_p9 = pnand %p265_p8, %p262_p7 }
 0x2f4   :  { %270 = shalt.err (!%p267_p9)
}
 0x2f5   :  { %160 = dma.vmem_to_hbm [thread:$0]  %s158_s6, 16, %s348_s2, [#allocation4]  }
 0x2f6   :  { %275 = dma.done.wait [#allocation4], 16  }
 0x2f7   :  { %276 = vsyncadd [#allocation4], 4294967280 }
 0x2f8   :  { %164 = vsyncpa [#allocation3], 1 }
 0x2f9   :  { %165 = vsyncpa [#allocation6], 1 }
 0x2fa   :  { %166 = vsyncpa [#allocation4], 1 }

</bundles_post_ra>
